<compile_context>
chip_gen: v6e
topology: v6e:2x2x1
jax: 0.10.0
libtpu: 0.0.40
codegen_flags: <defaults>
</compile_context>

<pallas_src>
import functools

import numpy as np
import jax
import jax.numpy as jnp
from jax import lax
from jax.experimental import pallas as pl
from jax.experimental.pallas import tpu as pltpu


def _win(start: int, size: int, stride: int):
    # Strided window along a (non-lane) ref dimension; static start/size/stride.
    return pl.ds(start, size) if stride == 1 else pl.ds(start, size, stride=stride)


def _to_pair(v):
    if isinstance(v, (tuple, list)):
        assert len(v) == 2
        return int(v[0]), int(v[1])
    return int(v), int(v)


def _largest_divisor_leq(n: int, cap: int) -> int:
    cap = max(1, min(cap, n))
    for d in range(cap, 0, -1):
        if n % d == 0:
            return d
    return 1


def _maxpool_kernel(x_ref, o_ref, *scratch, kH, kW, sH, sW, pH, pW, H, W,
                    H_out, W_span, pad_val):
    # x_ref: (TBC, H, W)          un-padded NCHW slab (B*C folded), W on lanes
    # o_ref: (TBC, H_out, W_span) W-dense output (subsampled by sW in wrapper)
    # scratch: [xpad (TBC, H_pad, W_pad) if padded], col (TBC, H_pad, W_span)
    tbc = x_ref.shape[0]
    H_pad, W_pad = H + 2 * pH, W + 2 * pW

    if pH or pW:
        xpad_ref, col_ref = scratch
        dt = xpad_ref.dtype
        # Re-fill the tiny pad border strips every grid step (cheap; safe even
        # if the grid is sharded across TensorCores), then copy the block into
        # the interior.  The pad never touches HBM.
        if pH:
            strip_h = jnp.full((tbc, pH, W_pad), pad_val, dt)
            xpad_ref[:, pl.ds(0, pH), :] = strip_h
            xpad_ref[:, pl.ds(pH + H, pH), :] = strip_h
        if pW:
            strip_w = jnp.full((tbc, H_pad, pW), pad_val, dt)
            xpad_ref[:, :, pl.ds(0, pW)] = strip_w
            xpad_ref[:, :, pl.ds(pW + W, pW)] = strip_w
        xpad_ref[:, pl.ds(pH, H), pl.ds(pW, W)] = x_ref[...]
        src = xpad_ref
    else:
        (col_ref,) = scratch
        src = x_ref

    # Stage 1 (separable max, W direction): unit-stride lane-shifted views,
    # elementwise max on the VPU.  kW loads instead of kH*kW.
    acc = src[:, :, pl.ds(0, W_span)]
    for kw in range(1, kW):
        acc = jnp.maximum(acc, src[:, :, pl.ds(kw, W_span)])
    col_ref[...] = acc

    # Stage 2 (H direction): stride-sH sublane reads of the column maxima.
    acc = col_ref[:, _win(0, H_out, sH), :]
    for kh in range(1, kH):
        acc = jnp.maximum(acc, col_ref[:, _win(kh, H_out, sH), :])
    o_ref[...] = acc


class MaxPool2d:
    """JAX/Pallas re-implementation of the PyTorch MaxPool2d module.

    NCHW, ceil_mode=False, dilation=1, return_indices=False (matching the
    reference forward, which calls F.max_pool2d with defaults).  Note the
    module default padding=1 mirrors the reference class (torch's own layer
    default is 0).
    """

    def __init__(self, kernel_size: int, stride: int | None = None, padding: int = 1):
        self.kernel_size = kernel_size
        self.stride = stride
        self.padding = padding

    def __call__(self, x: jax.Array) -> jax.Array:
        kH, kW = _to_pair(self.kernel_size)
        sH, sW = _to_pair(self.stride) if self.stride is not None else (kH, kW)
        pH, pW = _to_pair(self.padding)
        assert pH <= kH // 2 and pW <= kW // 2, "padding must be <= kernel_size // 2"

        B, C, H, W = x.shape
        H_out = (H + 2 * pH - kH) // sH + 1
        W_out = (W + 2 * pW - kW) // sW + 1
        assert H_out > 0 and W_out > 0
        H_pad, W_pad = H + 2 * pH, W + 2 * pW
        W_span = (W_out - 1) * sW + 1  # dense (unit-stride) W extent of stage-1 maxima

        if jnp.issubdtype(x.dtype, jnp.floating):
            pad_val = -float("inf")
        elif jnp.issubdtype(x.dtype, jnp.integer):
            pad_val = int(jnp.iinfo(x.dtype).min)
        else:
            raise NotImplementedError(f"unsupported dtype for max_pool2d: {x.dtype}")

        # Fold B and C into one axis (free, contiguous view of NCHW).
        BC = B * C
        x_bc = x.reshape(BC, H, W)

        # Block size over the folded B*C axis from a VMEM budget:
        #   double-buffered input + output blocks + pad/colmax scratches.
        itemsize = x.dtype.itemsize
        per_slice = itemsize * (2 * H * W + 2 * H_out * W_span
                                + H_pad * W_pad + H_pad * W_span)
        budget = 8 * 1024 * 1024  # safe on v5e (16 MiB scoped) and v7x (64 MiB phys)
        cap = max(1, budget // per_slice)
        # Keep >=2 grid steps (pipelining + v7x megacore) while blocks stay large.
        if BC >= 2 and per_slice * (BC // 2) >= (512 << 10):
            cap = min(cap, BC // 2)
        tbc = _largest_divisor_leq(BC, cap)
        n_steps = BC // tbc

        scratch_shapes = []
        if pH or pW:
            scratch_shapes.append(pltpu.VMEM((tbc, H_pad, W_pad), x.dtype))
        scratch_shapes.append(pltpu.VMEM((tbc, H_pad, W_span), x.dtype))

        kernel = functools.partial(
            _maxpool_kernel, kH=kH, kW=kW, sH=sH, sW=sW, pH=pH, pW=pW,
            H=H, W=W, H_out=H_out, W_span=W_span, pad_val=pad_val,
        )

        y_dense = pl.pallas_call(
            kernel,
            out_shape=jax.ShapeDtypeStruct((BC, H_out, W_span), x.dtype),
            grid_spec=pltpu.PrefetchScalarGridSpec(
                num_scalar_prefetch=0,
                grid=(n_steps,),
                in_specs=[pl.BlockSpec((tbc, H, W), lambda i: (i, 0, 0))],
                out_specs=pl.BlockSpec((tbc, H_out, W_span), lambda i: (i, 0, 0)),
                scratch_shapes=scratch_shapes,
            ),
            compiler_params=pltpu.CompilerParams(
                dimension_semantics=("parallel",),
                vmem_limit_bytes=32 * 1024 * 1024,
            ),
        )(x_bc)

        # Final stride-sW subsample along W (output-sized); no-op when sW == 1.
        if sW > 1:
            y = lax.slice(y_dense, (0, 0, 0), (BC, H_out, W_span), (1, 1, sW))
        else:
            y = y_dense
        return y.reshape(B, C, H_out, W_out)


if __name__ == "__main__":
    key = jax.random.PRNGKey(0)
    # NCHW input: batch=2, channels=4, 16x16 spatial.
    x = jax.random.normal(key, (2, 4, 16, 16), dtype=jnp.float32)

    def ref_maxpool(x, k, s, p):
        # PyTorch max_pool2d equivalent: max over windows, -inf padding.
        return lax.reduce_window(
            x,
            -jnp.inf,
            lax.max,
            window_dimensions=(1, 1, k, k),
            window_strides=(1, 1, s, s),
            padding=((0, 0), (0, 0), (p, p), (p, p)),
        )

    # Config 1: module defaults (stride=None -> stride=kernel_size), padding=1.
    pool = MaxPool2d(kernel_size=2, stride=None, padding=1)
    y = jax.block_until_ready(pool(x))
    expected = ref_maxpool(x, 2, 2, 1)
    assert y.shape == expected.shape == (2, 4, 9, 9), y.shape
    assert y.dtype == x.dtype
    np.testing.assert_allclose(np.asarray(y), np.asarray(expected), rtol=0, atol=0)

    # Config 2: overlapping windows (kernel=3, stride=2, padding=1).
    pool2 = MaxPool2d(kernel_size=3, stride=2, padding=1)
    y2 = jax.block_until_ready(pool2(x))
    expected2 = ref_maxpool(x, 3, 2, 1)
    assert y2.shape == expected2.shape == (2, 4, 8, 8), y2.shape
    np.testing.assert_allclose(np.asarray(y2), np.asarray(expected2), rtol=0, atol=0)

    print("KERNEL_OK")
</pallas_src>

<mosaic_0001>
module attributes {stable_mosaic.version = 11 : i64} {
  func.func @_maxpool_kernel(%arg0: i32, %arg1: memref<8x16x16xf32, #tpu.memory_space<vmem>>, %arg2: memref<8x9x17xf32, #tpu.memory_space<vmem>>, %arg3: memref<8x18x18xf32, #tpu.memory_space<vmem>>, %arg4: memref<8x18x17xf32, #tpu.memory_space<vmem>>) attributes {dimension_semantics = [#tpu.dimension_semantics<parallel>], iteration_bounds = array<i64: 1>, scalar_prefetch = 0 : i64, scratch_operands = 2 : i64, tpu.core_type = #tpu.core_type<tc>, window_params = [{transform_indices = @transform_0, window_bounds = array<i64: 8, 16, 16>}, {transform_indices = @transform_1, window_bounds = array<i64: 8, 9, 17>}]} {
    %cst = arith.constant 0xFF800000 : f32
    %0 = vector.broadcast %cst : f32 to vector<8x1x18xf32>
    %c0 = arith.constant 0 : index
    %c0_0 = arith.constant 0 : index
    %c0_1 = arith.constant 0 : index
    %1 = vector.load %arg3[%c0, %c0_0, %c0_1] : memref<8x18x18xf32, #tpu.memory_space<vmem>>, vector<8x1x18xf32>
    tpu.vector_store %arg3[%c0, %c0_0, %c0_1], %0 {strides = array<i32>} : memref<8x18x18xf32, #tpu.memory_space<vmem>>, vector<8x1x18xf32>,
    %c0_2 = arith.constant 0 : index
    %c17 = arith.constant 17 : index
    %c0_3 = arith.constant 0 : index
    %2 = vector.load %arg3[%c0_2, %c17, %c0_3] : memref<8x18x18xf32, #tpu.memory_space<vmem>>, vector<8x1x18xf32>
    tpu.vector_store %arg3[%c0_2, %c17, %c0_3], %0 {strides = array<i32>} : memref<8x18x18xf32, #tpu.memory_space<vmem>>, vector<8x1x18xf32>,
    %cst_4 = arith.constant 0xFF800000 : f32
    %3 = vector.broadcast %cst_4 : f32 to vector<8x18x1xf32>
    %c0_5 = arith.constant 0 : index
    %c0_6 = arith.constant 0 : index
    %c0_7 = arith.constant 0 : index
    %4 = vector.load %arg3[%c0_5, %c0_6, %c0_7] : memref<8x18x18xf32, #tpu.memory_space<vmem>>, vector<8x18x1xf32>
    tpu.vector_store %arg3[%c0_5, %c0_6, %c0_7], %3 {strides = array<i32>} : memref<8x18x18xf32, #tpu.memory_space<vmem>>, vector<8x18x1xf32>,
    %c0_8 = arith.constant 0 : index
    %c0_9 = arith.constant 0 : index
    %c17_10 = arith.constant 17 : index
    %5 = vector.load %arg3[%c0_8, %c0_9, %c17_10] : memref<8x18x18xf32, #tpu.memory_space<vmem>>, vector<8x18x1xf32>
    tpu.vector_store %arg3[%c0_8, %c0_9, %c17_10], %3 {strides = array<i32>} : memref<8x18x18xf32, #tpu.memory_space<vmem>>, vector<8x18x1xf32>,
    %c0_11 = arith.constant 0 : index
    %c0_12 = arith.constant 0 : index
    %c0_13 = arith.constant 0 : index
    %6 = vector.load %arg1[%c0_11, %c0_12, %c0_13] : memref<8x16x16xf32, #tpu.memory_space<vmem>>, vector<8x16x16xf32>
    %c0_14 = arith.constant 0 : index
    %c1 = arith.constant 1 : index
    %c1_15 = arith.constant 1 : index
    %7 = vector.load %arg3[%c0_14, %c1, %c1_15] : memref<8x18x18xf32, #tpu.memory_space<vmem>>, vector<8x16x16xf32>
    tpu.vector_store %arg3[%c0_14, %c1, %c1_15], %6 {strides = array<i32>} : memref<8x18x18xf32, #tpu.memory_space<vmem>>, vector<8x16x16xf32>,
    %c0_16 = arith.constant 0 : index
    %c0_17 = arith.constant 0 : index
    %c0_18 = arith.constant 0 : index
    %8 = vector.load %arg3[%c0_16, %c0_17, %c0_18] : memref<8x18x18xf32, #tpu.memory_space<vmem>>, vector<8x18x17xf32>
    %c0_19 = arith.constant 0 : index
    %c0_20 = arith.constant 0 : index
    %c1_21 = arith.constant 1 : index
    %9 = vector.load %arg3[%c0_19, %c0_20, %c1_21] : memref<8x18x18xf32, #tpu.memory_space<vmem>>, vector<8x18x17xf32>
    %10 = arith.maximumf %8, %9 : vector<8x18x17xf32>
    %c0_22 = arith.constant 0 : index
    %c0_23 = arith.constant 0 : index
    %c0_24 = arith.constant 0 : index
    %11 = vector.load %arg4[%c0_22, %c0_23, %c0_24] : memref<8x18x17xf32, #tpu.memory_space<vmem>>, vector<8x18x17xf32>
    tpu.vector_store %arg4[%c0_22, %c0_23, %c0_24], %10 {strides = array<i32>} : memref<8x18x17xf32, #tpu.memory_space<vmem>>, vector<8x18x17xf32>,
    %c0_25 = arith.constant 0 : index
    %c0_26 = arith.constant 0 : index
    %c0_27 = arith.constant 0 : index
    %12 = tpu.strided_load %arg4[%c0_25, %c0_26, %c0_27] {strides = array<i32: 1, 2, 1>} : memref<8x18x17xf32, #tpu.memory_space<vmem>>, vector<8x9x17xf32>
    %c0_28 = arith.constant 0 : index
    %c1_29 = arith.constant 1 : index
    %c0_30 = arith.constant 0 : index
    %13 = tpu.strided_load %arg4[%c0_28, %c1_29, %c0_30] {strides = array<i32: 1, 2, 1>} : memref<8x18x17xf32, #tpu.memory_space<vmem>>, vector<8x9x17xf32>
    %14 = arith.maximumf %12, %13 : vector<8x9x17xf32>
    %c0_31 = arith.constant 0 : index
    %c0_32 = arith.constant 0 : index
    %c0_33 = arith.constant 0 : index
    %15 = vector.load %arg2[%c0_31, %c0_32, %c0_33] : memref<8x9x17xf32, #tpu.memory_space<vmem>>, vector<8x9x17xf32>
    tpu.vector_store %arg2[%c0_31, %c0_32, %c0_33], %14 {strides = array<i32>} : memref<8x9x17xf32, #tpu.memory_space<vmem>>, vector<8x9x17xf32>,
    return
  }
  func.func @transform_0(%arg0: i32) -> (i32, i32, i32) {
    %c0_i32 = arith.constant 0 : i32
    %c0_i32_0 = arith.constant 0 : i32
    %c0_i32_1 = arith.constant 0 : i32
    return %arg0, %c0_i32, %c0_i32_0 : i32, i32, i32
  }
  func.func @transform_1(%arg0: i32) -> (i32, i32, i32) {
    %c0_i32 = arith.constant 0 : i32
    %c0_i32_0 = arith.constant 0 : i32
    %c0_i32_1 = arith.constant 0 : i32
    return %arg0, %c0_i32, %c0_i32_0 : i32, i32, i32
  }
}

</mosaic_0001>

<bundles_post_ra>
// kernel: tpu_custom_call.1
= control target key start
LH: loop header
LB: loop body
LE: loop exit
PB: predicated region body
PF: predicated region fallthrough
CT: control target
= control target key end

     0   :  { %6 = vsyncpa [#allocation5], 0  ;;  %s487_s6 = smov [#allocation4]   ;;  %s858_s0 = inlined_call_operand.hbm [shape: f32[8,16,16], index: 0, kind: input, shape index: {}]   ;;  %s859_s1 = inlined_call_operand.vmem [shape: f32[8,9,17], index: 1, kind: output, shape index: {}]  }
   0x1   :  { %s12_s7 = sshll.u32 %s487_s6, 4  ;;  %s13_s7 = int_to_ptr.vmem [resolvable:$true] %s12_s7 }
   0x2   :  { %s473_s8 = scalar_lea.vmem %s13_s7, 2048  ;;  %p478_p1 = scmp.lt.s32.totalorder %s13_s7, %s13_s7 }
   0x3   :  { %p474_p0 = scmp.ne.s32.totalorder %s13_s7, %s473_s8  ;;  %p479_p2 = scmp.lt.s32.totalorder %s473_s8, %s473_s8 }
   0x5   :  { %p480_p3 = por %p479_p2, %p478_p1 }
   0x7   :  { %p481_p4 = pnand %p480_p3, %p474_p0 }
   0x9   :  { %484 = shalt.err (!%p481_p4)
}
   0xa   :  { %s488_s9 = smov 128   ;;  %s489_s10 = smov 8  }
   0xb   :  { %18 = dma.hbm_to_vmem [thread:$0]  %s858_s0, 2048, %s13_s7, [#allocation5], %s488_s9, %s488_s9, %s489_s10  }
   0xc   :  { %485 = dma.done.wait [#allocation5], 2048  }
   0xd   :  { %486 = vsyncadd [#allocation5], 4294965248  ;;  %vm22_vm0 = vcmask 139264   ;;  %vm39_vm1 = vcmask 7168   ;;  %vm65_vm2 = vcmask 146568   ;;  %v490_v0 = vmov -inf  }
   0xe   :  { %23 = vst.msk [vmem:[#allocation2] sm:$0x1] %vm22_vm0, %v490_v0  ;;  %24 = vst.msk [vmem:[#allocation2 + $0x18] sm:$0x1] %vm22_vm0, %v490_v0  ;;  %vm42_vm3 = vcmask 1024   ;;  %vm68_vm4 = vcmask 140424  }
   0xf   :  { %41 = vst.msk [vmem:[#allocation2 + $0x8] sm:$0xff] %vm39_vm1, %v490_v0  ;;  %45 = vst.msk [vmem:[#allocation2 + $0x20] sm:$0xff] %vm39_vm1, %v490_v0  ;;  %v91_v1 = vld [vmem:[#allocation4] sm:$0xff]  ;;  %v93_v2 = vld [vmem:[#allocation4 + $0x10] sm:$0xff]  ;;  %s491_s0 = smov 1   ;;  %vm171_vm5 = vcmask 138248  }
  0x10   :  { %25 = vst.msk [vmem:[#allocation2 + $0x30] sm:$0x1] %vm22_vm0, %v490_v0  ;;  %26 = vst.msk [vmem:[#allocation2 + $0x48] sm:$0x1] %vm22_vm0, %v490_v0  ;;  %123 = vrot.lane.b32.xlu0 %v91_v1, %s491_s0  ;;  %127 = vrot.lane.b32.xlu1 %v93_v2, %s491_s0  ;;  %v92_v3 = vld [vmem:[#allocation4 + $0x8] sm:$0xff]  ;;  %v94_v4 = vld [vmem:[#allocation4 + $0x18] sm:$0xff] }
  0x11   :  { %27 = vst.msk [vmem:[#allocation2 + $0x60] sm:$0x1] %vm22_vm0, %v490_v0  ;;  %28 = vst.msk [vmem:[#allocation2 + $0x78] sm:$0x1] %vm22_vm0, %v490_v0  ;;  %v95_v5 = vld [vmem:[#allocation4 + $0x20] sm:$0xff]  ;;  %v96_v6 = vld [vmem:[#allocation4 + $0x28] sm:$0xff] }
  0x12   :  { %29 = vst.msk [vmem:[#allocation2 + $0x90] sm:$0x1] %vm22_vm0, %v490_v0  ;;  %30 = vst.msk [vmem:[#allocation2 + $0xa8] sm:$0x1] %vm22_vm0, %v490_v0  ;;  %v98_v7 = vld [vmem:[#allocation4 + $0x38] sm:$0xff]  ;;  %v97_v8 = vld [vmem:[#allocation4 + $0x30] sm:$0xff] }
  0x13   :  { %31 = vst.msk [vmem:[#allocation2 + $0x11] sm:$0x1] %vm22_vm0, %v490_v0  ;;  %32 = vst.msk [vmem:[#allocation2 + $0x29] sm:$0x1] %vm22_vm0, %v490_v0  ;;  %v99_v9 = vld [vmem:[#allocation4 + $0x40] sm:$0xff]  ;;  %v100_v10 = vld [vmem:[#allocation4 + $0x48] sm:$0xff] }
  0x14   :  { %33 = vst.msk [vmem:[#allocation2 + $0x41] sm:$0x1] %vm22_vm0, %v490_v0  ;;  %34 = vst.msk [vmem:[#allocation2 + $0x59] sm:$0x1] %vm22_vm0, %v490_v0  ;;  %125 = vrot.lane.b32.xlu0 %v92_v3, %s491_s0  ;;  %129 = vrot.lane.b32.xlu1 %v94_v4, %s491_s0  ;;  %v102_v11 = vld [vmem:[#allocation4 + $0x58] sm:$0xff]  ;;  %v101_v12 = vld [vmem:[#allocation4 + $0x50] sm:$0xff] }
  0x15   :  { %35 = vst.msk [vmem:[#allocation2 + $0x71] sm:$0x1] %vm22_vm0, %v490_v0  ;;  %36 = vst.msk [vmem:[#allocation2 + $0x89] sm:$0x1] %vm22_vm0, %v490_v0  ;;  %v103_v13 = vld [vmem:[#allocation4 + $0x60] sm:$0xff]  ;;  %v104_v14 = vld [vmem:[#allocation4 + $0x68] sm:$0xff] }
  0x16   :  { %37 = vst.msk [vmem:[#allocation2 + $0xa1] sm:$0x1] %vm22_vm0, %v490_v0  ;;  %38 = vst.msk [vmem:[#allocation2 + $0xb9] sm:$0x1] %vm22_vm0, %v490_v0  ;;  %v106_v15 = vld [vmem:[#allocation4 + $0x78] sm:$0xff]  ;;  %v105_v16 = vld [vmem:[#allocation4 + $0x70] sm:$0xff] }
  0x17   :  { %48 = vst.msk [vmem:[#allocation2 + $0x38] sm:$0xff] %vm39_vm1, %v490_v0  ;;  %51 = vst.msk [vmem:[#allocation2 + $0x50] sm:$0xff] %vm39_vm1, %v490_v0  ;;  %s492_s13 = smov 127   ;;  %vm332_vm6 = vcmask 138240   ;;  %vm335_vm7 = vcmask 132096   ;;  %vm438_vm8 = vcmask 131072  }
  0x18   :  { %54 = vst.msk [vmem:[#allocation2 + $0x68] sm:$0xff] %vm39_vm1, %v490_v0  ;;  %57 = vst.msk [vmem:[#allocation2 + $0x80] sm:$0xff] %vm39_vm1, %v490_v0  ;;  %131 = vrot.lane.b32.xlu0 %v95_v5, %s491_s0  ;;  %133 = vrot.lane.b32.xlu1 %v96_v6, %s491_s0 }
  0x19   :  { %60 = vst.msk [vmem:[#allocation2 + $0x98] sm:$0xff] %vm39_vm1, %v490_v0  ;;  %63 = vst.msk [vmem:[#allocation2 + $0xb0] sm:$0xff] %vm39_vm1, %v490_v0 }
  0x1a   :  { %40 = vst.msk [vmem:[#allocation2] sm:$0xff] %vm39_vm1, %v490_v0  ;;  %44 = vst.msk [vmem:[#allocation2 + $0x18] sm:$0xff] %vm39_vm1, %v490_v0 }
  0x1b   :  { %67 = vst.msk [vmem:[#allocation2 + $0x8] sm:$0xff] %vm65_vm2, %v490_v0  ;;  %71 = vst.msk [vmem:[#allocation2 + $0x20] sm:$0xff] %vm65_vm2, %v490_v0 }
  0x1c   :  { %47 = vst.msk [vmem:[#allocation2 + $0x30] sm:$0xff] %vm39_vm1, %v490_v0  ;;  %50 = vst.msk [vmem:[#allocation2 + $0x48] sm:$0xff] %vm39_vm1, %v490_v0  ;;  %137 = vrot.lane.b32.xlu1 %v98_v7, %s491_s0  ;;  %135 = vrot.lane.b32.xlu0 %v97_v8, %s491_s0 }
  0x1d   :  { %53 = vst.msk [vmem:[#allocation2 + $0x60] sm:$0xff] %vm39_vm1, %v490_v0  ;;  %56 = vst.msk [vmem:[#allocation2 + $0x78] sm:$0xff] %vm39_vm1, %v490_v0 }
  0x1e   :  { %59 = vst.msk [vmem:[#allocation2 + $0x90] sm:$0xff] %vm39_vm1, %v490_v0  ;;  %62 = vst.msk [vmem:[#allocation2 + $0xa8] sm:$0xff] %vm39_vm1, %v490_v0 }
  0x1f   :  { %74 = vst.msk [vmem:[#allocation2 + $0x38] sm:$0xff] %vm65_vm2, %v490_v0  ;;  %77 = vst.msk [vmem:[#allocation2 + $0x50] sm:$0xff] %vm65_vm2, %v490_v0 }
  0x20   :  { %80 = vst.msk [vmem:[#allocation2 + $0x68] sm:$0xff] %vm65_vm2, %v490_v0  ;;  %83 = vst.msk [vmem:[#allocation2 + $0x80] sm:$0xff] %vm65_vm2, %v490_v0  ;;  %139 = vrot.lane.b32.xlu0 %v99_v9, %s491_s0  ;;  %141 = vrot.lane.b32.xlu1 %v100_v10, %s491_s0 }
  0x21   :  { %86 = vst.msk [vmem:[#allocation2 + $0x98] sm:$0xff] %vm65_vm2, %v490_v0  ;;  %89 = vst.msk [vmem:[#allocation2 + $0xb0] sm:$0xff] %vm65_vm2, %v490_v0 }
  0x22   :  { %43 = vst.msk [vmem:[#allocation2 + $0x10] sm:$0x3] %vm42_vm3, %v490_v0  ;;  %46 = vst.msk [vmem:[#allocation2 + $0x28] sm:$0x3] %vm42_vm3, %v490_v0 }
  0x23   :  { %49 = vst.msk [vmem:[#allocation2 + $0x40] sm:$0x3] %vm42_vm3, %v490_v0  ;;  %52 = vst.msk [vmem:[#allocation2 + $0x58] sm:$0x3] %vm42_vm3, %v490_v0 }
  0x24   :  { %55 = vst.msk [vmem:[#allocation2 + $0x70] sm:$0x3] %vm42_vm3, %v490_v0  ;;  %58 = vst.msk [vmem:[#allocation2 + $0x88] sm:$0x3] %vm42_vm3, %v490_v0  ;;  %145 = vrot.lane.b32.xlu1 %v102_v11, %s491_s0  ;;  %143 = vrot.lane.b32.xlu0 %v101_v12, %s491_s0 }
  0x25   :  { %61 = vst.msk [vmem:[#allocation2 + $0xa0] sm:$0x3] %vm42_vm3, %v490_v0  ;;  %64 = vst.msk [vmem:[#allocation2 + $0xb8] sm:$0x3] %vm42_vm3, %v490_v0 }
  0x26   :  { %66 = vst.msk [vmem:[#allocation2] sm:$0xff] %vm65_vm2, %v490_v0  ;;  %70 = vst.msk [vmem:[#allocation2 + $0x18] sm:$0xff] %vm65_vm2, %v490_v0 }
  0x27   :  { %69 = vst.msk [vmem:[#allocation2 + $0x10] sm:$0x3] %vm68_vm4, %v490_v0  ;;  %72 = vst.msk [vmem:[#allocation2 + $0x28] sm:$0x3] %vm68_vm4, %v490_v0 }
  0x28   :  { %73 = vst.msk [vmem:[#allocation2 + $0x30] sm:$0xff] %vm65_vm2, %v490_v0  ;;  %76 = vst.msk [vmem:[#allocation2 + $0x48] sm:$0xff] %vm65_vm2, %v490_v0  ;;  %147 = vrot.lane.b32.xlu0 %v103_v13, %s491_s0  ;;  %149 = vrot.lane.b32.xlu1 %v104_v14, %s491_s0 }
  0x29   :  { %79 = vst.msk [vmem:[#allocation2 + $0x60] sm:$0xff] %vm65_vm2, %v490_v0  ;;  %82 = vst.msk [vmem:[#allocation2 + $0x78] sm:$0xff] %vm65_vm2, %v490_v0 }
  0x2a   :  { %85 = vst.msk [vmem:[#allocation2 + $0x90] sm:$0xff] %vm65_vm2, %v490_v0  ;;  %88 = vst.msk [vmem:[#allocation2 + $0xa8] sm:$0xff] %vm65_vm2, %v490_v0 }
  0x2b   :  { %75 = vst.msk [vmem:[#allocation2 + $0x40] sm:$0x3] %vm68_vm4, %v490_v0  ;;  %78 = vst.msk [vmem:[#allocation2 + $0x58] sm:$0x3] %vm68_vm4, %v490_v0 }
  0x2c   :  { %81 = vst.msk [vmem:[#allocation2 + $0x70] sm:$0x3] %vm68_vm4, %v490_v0  ;;  %84 = vst.msk [vmem:[#allocation2 + $0x88] sm:$0x3] %vm68_vm4, %v490_v0  ;;  %153 = vrot.lane.b32.xlu1 %v106_v15, %s491_s0  ;;  %151 = vrot.lane.b32.xlu0 %v105_v16, %s491_s0 }
  0x2d   :  { %87 = vst.msk [vmem:[#allocation2 + $0xa0] sm:$0x3] %vm68_vm4, %v490_v0  ;;  %90 = vst.msk [vmem:[#allocation2 + $0xb8] sm:$0x3] %vm68_vm4, %v490_v0 }
  0x82   :  { %v124_v17 = vpop.permute.xlu0 %123  ;;  %v128_v18 = vpop.permute.xlu1 %127 }
  0x83   :  { %172 = vst.msk [vmem:[#allocation2 + $0x1] sm:$0xff] %vm171_vm5, %v124_v17  ;;  %174 = vst.msk [vmem:[#allocation2 + $0x19] sm:$0xff] %vm171_vm5, %v128_v18 }
  0x86   :  { %v126_v19 = vpop.permute.xlu0 %125  ;;  %v130_v20 = vpop.permute.xlu1 %129 }
  0x87   :  { %173 = vst.msk [vmem:[#allocation2 + $0x9] sm:$0xff] %vm171_vm5, %v126_v19  ;;  %175 = vst.msk [vmem:[#allocation2 + $0x21] sm:$0xff] %vm171_vm5, %v130_v20 }
  0x8a   :  { %v638_v21 = vld [vmem:[#allocation2] sm:$0xff]  ;;  %v132_v22 = vpop.permute.xlu0 %131  ;;  %v134_v23 = vpop.permute.xlu1 %133  ;;  %v654_v28 = vld [vmem:[#allocation2 + $0x18] sm:$0xff] }
  0x8b   :  { %236 = vrot.lane.b32.xlu0 %v638_v21, %s492_s13  ;;  %176 = vst.msk [vmem:[#allocation2 + $0x31] sm:$0xff] %vm171_vm5, %v132_v22  ;;  %177 = vst.msk [vmem:[#allocation2 + $0x39] sm:$0xff] %vm171_vm5, %v134_v23 }
  0x8e   :  { %v644_v24 = vld [vmem:[#allocation2 + $0x8] sm:$0xff]  ;;  %v646_v25 = vld [vmem:[#allocation2 + $0x10] sm:$0x3]  ;;  %v138_v26 = vpop.permute.xlu1 %137  ;;  %v136_v27 = vpop.permute.xlu0 %135  ;;  %v656_v29 = vld [vmem:[#allocation2 + $0x20] sm:$0xff] }
  0x8f   :  { %238 = vrot.lane.b32.xlu1 %v644_v24, %s492_s13  ;;  %240 = vrot.lane.b32.xlu0 %v646_v25, %s492_s13  ;;  %179 = vst.msk [vmem:[#allocation2 + $0x51] sm:$0xff] %vm171_vm5, %v138_v26  ;;  %178 = vst.msk [vmem:[#allocation2 + $0x49] sm:$0xff] %vm171_vm5, %v136_v27  ;;  %v664_v32 = vld [vmem:[#allocation2 + $0x28] sm:$0x3] }
  0x92   :  { %v140_v30 = vpop.permute.xlu0 %139  ;;  %v142_v31 = vpop.permute.xlu1 %141  ;;  %v666_v33 = vld [vmem:[#allocation2 + $0x30] sm:$0xff]  ;;  %v674_v36 = vld [vmem:[#allocation2 + $0x38] sm:$0xff]  ;;  %v676_v37 = vld [vmem:[#allocation2 + $0x40] sm:$0x3] }
  0x93   :  { %242 = vrot.lane.b32.xlu1 %v654_v28, %s492_s13  ;;  %244 = vrot.lane.b32.xlu0 %v656_v29, %s492_s13  ;;  %180 = vst.msk [vmem:[#allocation2 + $0x61] sm:$0xff] %vm171_vm5, %v140_v30  ;;  %181 = vst.msk [vmem:[#allocation2 + $0x69] sm:$0xff] %vm171_vm5, %v142_v31 }
  0x96   :  { %v146_v34 = vpop.permute.xlu1 %145  ;;  %v144_v35 = vpop.permute.xlu0 %143  ;;  %v684_v40 = vld [vmem:[#allocation2 + $0x48] sm:$0xff]  ;;  %v686_v41 = vld [vmem:[#allocation2 + $0x50] sm:$0xff]  ;;  %v694_v44 = vld [vmem:[#allocation2 + $0x58] sm:$0x3] }
  0x97   :  { %246 = vrot.lane.b32.xlu1 %v664_v32, %s492_s13  ;;  %248 = vrot.lane.b32.xlu0 %v666_v33, %s492_s13  ;;  %183 = vst.msk [vmem:[#allocation2 + $0x81] sm:$0xff] %vm171_vm5, %v146_v34  ;;  %182 = vst.msk [vmem:[#allocation2 + $0x79] sm:$0xff] %vm171_vm5, %v144_v35 }
  0x9a   :  { %v148_v38 = vpop.permute.xlu0 %147  ;;  %v150_v39 = vpop.permute.xlu1 %149  ;;  %v696_v45 = vld [vmem:[#allocation2 + $0x60] sm:$0xff]  ;;  %v702_v46 = vld [vmem:[#allocation2 + $0x68] sm:$0xff]  ;;  %v704_v47 = vld [vmem:[#allocation2 + $0x70] sm:$0x3] }
  0x9b   :  { %250 = vrot.lane.b32.xlu1 %v674_v36, %s492_s13  ;;  %252 = vrot.lane.b32.xlu0 %v676_v37, %s492_s13  ;;  %184 = vst.msk [vmem:[#allocation2 + $0x91] sm:$0xff] %vm171_vm5, %v148_v38  ;;  %185 = vst.msk [vmem:[#allocation2 + $0x99] sm:$0xff] %vm171_vm5, %v150_v39 }
  0x9e   :  { %v154_v42 = vpop.permute.xlu1 %153  ;;  %v152_v43 = vpop.permute.xlu0 %151  ;;  %v710_v48 = vld [vmem:[#allocation2 + $0x78] sm:$0xff]  ;;  %v712_v49 = vld [vmem:[#allocation2 + $0x80] sm:$0xff]  ;;  %v718_v50 = vld [vmem:[#allocation2 + $0x88] sm:$0x3] }
  0x9f   :  { %254 = vrot.lane.b32.xlu1 %v684_v40, %s492_s13  ;;  %256 = vrot.lane.b32.xlu0 %v686_v41, %s492_s13  ;;  %187 = vst.msk [vmem:[#allocation2 + $0xb1] sm:$0xff] %vm171_vm5, %v154_v42  ;;  %186 = vst.msk [vmem:[#allocation2 + $0xa9] sm:$0xff] %vm171_vm5, %v152_v43 }
  0xa2   :  { %v720_v51 = vld [vmem:[#allocation2 + $0x90] sm:$0xff]  ;;  %v726_v52 = vld [vmem:[#allocation2 + $0x98] sm:$0xff]  ;;  %v728_v53 = vld [vmem:[#allocation2 + $0xa0] sm:$0x3] }
  0xa3   :  { %258 = vrot.lane.b32.xlu1 %v694_v44, %s492_s13  ;;  %260 = vrot.lane.b32.xlu0 %v696_v45, %s492_s13 }
  0xa6   :  { %v734_v54 = vld [vmem:[#allocation2 + $0xa8] sm:$0xff]  ;;  %v736_v55 = vld [vmem:[#allocation2 + $0xb0] sm:$0xff]  ;;  %v742_v56 = vld [vmem:[#allocation2 + $0xb8] sm:$0x3] }
  0xa7   :  { %262 = vrot.lane.b32.xlu1 %v702_v46, %s492_s13  ;;  %264 = vrot.lane.b32.xlu0 %v704_v47, %s492_s13 }
  0xab   :  { %266 = vrot.lane.b32.xlu1 %v710_v48, %s492_s13  ;;  %268 = vrot.lane.b32.xlu0 %v712_v49, %s492_s13 }
  0xaf   :  { %270 = vrot.lane.b32.xlu1 %v718_v50, %s492_s13  ;;  %272 = vrot.lane.b32.xlu0 %v720_v51, %s492_s13 }
  0xb3   :  { %274 = vrot.lane.b32.xlu1 %v726_v52, %s492_s13  ;;  %276 = vrot.lane.b32.xlu0 %v728_v53, %s492_s13 }
  0xb7   :  { %278 = vrot.lane.b32.xlu1 %v734_v54, %s492_s13  ;;  %280 = vrot.lane.b32.xlu0 %v736_v55, %s492_s13 }
  0xbb   :  { %282 = vrot.lane.b32.xlu1 %v742_v56, %s492_s13 }
  0xfd   :  { %v237_v57 = vpop.permute.xlu0 %236 }
  0xfe   :  { %v308_v58 = vmax.f32 %v638_v21, %v237_v57 }
 0x100   :  { %333 = vst.msk [vmem:[#allocation3] sm:$0xff] %vm332_vm6, %v308_v58 }
 0x101   :  { %v239_v59 = vpop.permute.xlu1 %238  ;;  %v241_v60 = vpop.permute.xlu0 %240 }
 0x102   :  { %v309_v61 = vmax.f32 %v644_v24, %v239_v59  ;;  %v310_v62 = vmax.f32 %v646_v25, %v241_v60 }
 0x104   :  { %334 = vst.msk [vmem:[#allocation3 + $0x8] sm:$0xff] %vm332_vm6, %v309_v61 }
 0x105   :  { %336 = vst.msk [vmem:[#allocation3 + $0x10] sm:$0x3] %vm335_vm7, %v310_v62  ;;  %v243_v63 = vpop.permute.xlu1 %242  ;;  %v245_v0 = vpop.permute.xlu0 %244 }
 0x106   :  { %v311_v1 = vmax.f32 %v654_v28, %v243_v63  ;;  %v312_v2 = vmax.f32 %v656_v29, %v245_v0 }
 0x108   :  { %337 = vst.msk [vmem:[#allocation3 + $0x18] sm:$0xff] %vm332_vm6, %v311_v1  ;;  %338 = vst.msk [vmem:[#allocation3 + $0x20] sm:$0xff] %vm332_vm6, %v312_v2 }
 0x109   :  { %v247_v3 = vpop.permute.xlu1 %246  ;;  %v249_v4 = vpop.permute.xlu0 %248 }
 0x10a   :  { %v313_v5 = vmax.f32 %v664_v32, %v247_v3  ;;  %v314_v6 = vmax.f32 %v666_v33, %v249_v4 }
 0x10b   :  { %v358_v7 = vld [vmem:[#allocation3] ss:$2 sm:$0xff]  ;;  %v390_v8 = vld [vmem:[#allocation3 + $0x1] ss:$2 sm:$0xff] }
 0x10c   :  { %v421_v9 = vmax.f32 %v358_v7, %v390_v8  ;;  %v360_v10 = vld [vmem:[#allocation3 + $0x10] ss:$2 sm:$0x1]  ;;  %v392_v11 = vld [vmem:[#allocation3 + $0x11] ss:$2 sm:$0x1] }
 0x10d   :  { %339 = vst.msk [vmem:[#allocation3 + $0x28] sm:$0x3] %vm335_vm7, %v313_v5  ;;  %v422_v12 = vmax.f32 %v360_v10, %v392_v11  ;;  %v251_v13 = vpop.permute.xlu1 %250  ;;  %v253_v14 = vpop.permute.xlu0 %252 }
 0x10e   :  { %340 = vst.msk [vmem:[#allocation3 + $0x30] sm:$0xff] %vm332_vm6, %v314_v6  ;;  %437 = vst.msk [vmem:[%s859_s1] sm:$0xff] %vm332_vm6, %v421_v9  ;;  %v315_v15 = vmax.f32 %v674_v36, %v251_v13  ;;  %v316_v16 = vmax.f32 %v676_v37, %v253_v14 }
 0x10f   :  { %439 = vst.msk [vmem:[%s859_s1 + $0x8] sm:$0x1] %vm438_vm8, %v422_v12  ;;  %v362_v17 = vld [vmem:[#allocation3 + $0x18] ss:$2 sm:$0xff]  ;;  %v394_v18 = vld [vmem:[#allocation3 + $0x19] ss:$2 sm:$0xff] }
 0x110   :  { %v423_v19 = vmax.f32 %v362_v17, %v394_v18  ;;  %341 = vst.msk [vmem:[#allocation3 + $0x38] sm:$0xff] %vm332_vm6, %v315_v15 }
 0x111   :  { %342 = vst.msk [vmem:[#allocation3 + $0x40] sm:$0x3] %vm335_vm7, %v316_v16  ;;  %v255_v20 = vpop.permute.xlu1 %254  ;;  %v257_v21 = vpop.permute.xlu0 %256 }
 0x112   :  { %440 = vst.msk [vmem:[%s859_s1 + $0x10] sm:$0xff] %vm332_vm6, %v423_v19  ;;  %v317_v22 = vmax.f32 %v684_v40, %v255_v20  ;;  %v318_v23 = vmax.f32 %v686_v41, %v257_v21 }
 0x114   :  { %v364_v24 = vld [vmem:[#allocation3 + $0x28] ss:$2 sm:$0x1]  ;;  %v396_v25 = vld [vmem:[#allocation3 + $0x29] ss:$2 sm:$0x1] }
 0x115   :  { %v424_v26 = vmax.f32 %v364_v24, %v396_v25  ;;  %343 = vst.msk [vmem:[#allocation3 + $0x48] sm:$0xff] %vm332_vm6, %v317_v22  ;;  %344 = vst.msk [vmem:[#allocation3 + $0x50] sm:$0xff] %vm332_vm6, %v318_v23  ;;  %v259_v27 = vpop.permute.xlu1 %258  ;;  %v261_v28 = vpop.permute.xlu0 %260 }
 0x116   :  { %v319_v29 = vmax.f32 %v694_v44, %v259_v27  ;;  %v320_v30 = vmax.f32 %v696_v45, %v261_v28 }
 0x117   :  { %441 = vst.msk [vmem:[%s859_s1 + $0x18] sm:$0x1] %vm438_vm8, %v424_v26  ;;  %v366_v31 = vld [vmem:[#allocation3 + $0x30] ss:$2 sm:$0xff]  ;;  %v398_v32 = vld [vmem:[#allocation3 + $0x31] ss:$2 sm:$0xff] }
 0x118   :  { %v425_v33 = vmax.f32 %v366_v31, %v398_v32  ;;  %v368_v34 = vld [vmem:[#allocation3 + $0x40] ss:$2 sm:$0x1]  ;;  %v400_v35 = vld [vmem:[#allocation3 + $0x41] ss:$2 sm:$0x1] }
 0x119   :  { %345 = vst.msk [vmem:[#allocation3 + $0x58] sm:$0x3] %vm335_vm7, %v319_v29  ;;  %v426_v36 = vmax.f32 %v368_v34, %v400_v35  ;;  %v263_v37 = vpop.permute.xlu1 %262  ;;  %v265_v38 = vpop.permute.xlu0 %264 }
 0x11a   :  { %346 = vst.msk [vmem:[#allocation3 + $0x60] sm:$0xff] %vm332_vm6, %v320_v30  ;;  %442 = vst.msk [vmem:[%s859_s1 + $0x20] sm:$0xff] %vm332_vm6, %v425_v33  ;;  %v321_v39 = vmax.f32 %v702_v46, %v263_v37  ;;  %v322_v40 = vmax.f32 %v704_v47, %v265_v38 }
 0x11b   :  { %443 = vst.msk [vmem:[%s859_s1 + $0x28] sm:$0x1] %vm438_vm8, %v426_v36 }
 0x11c   :  { %v370_v41 = vld [vmem:[#allocation3 + $0x48] ss:$2 sm:$0xff]  ;;  %v402_v42 = vld [vmem:[#allocation3 + $0x49] ss:$2 sm:$0xff]  ;;  %347 = vst.msk [vmem:[#allocation3 + $0x68] sm:$0xff] %vm332_vm6, %v321_v39 }
 0x11d   :  { %v427_v43 = vmax.f32 %v370_v41, %v402_v42  ;;  %348 = vst.msk [vmem:[#allocation3 + $0x70] sm:$0x3] %vm335_vm7, %v322_v40  ;;  %v267_v44 = vpop.permute.xlu1 %266  ;;  %v269_v45 = vpop.permute.xlu0 %268 }
 0x11e   :  { %v323_v46 = vmax.f32 %v710_v48, %v267_v44  ;;  %v324_v47 = vmax.f32 %v712_v49, %v269_v45 }
 0x11f   :  { %444 = vst.msk [vmem:[%s859_s1 + $0x30] sm:$0xff] %vm332_vm6, %v427_v43 }
 0x120   :  { %v372_v57 = vld [vmem:[#allocation3 + $0x58] ss:$2 sm:$0x1]  ;;  %v404_v58 = vld [vmem:[#allocation3 + $0x59] ss:$2 sm:$0x1] }
 0x121   :  { %v428_v59 = vmax.f32 %v372_v57, %v404_v58  ;;  %349 = vst.msk [vmem:[#allocation3 + $0x78] sm:$0xff] %vm332_vm6, %v323_v46  ;;  %350 = vst.msk [vmem:[#allocation3 + $0x80] sm:$0xff] %vm332_vm6, %v324_v47  ;;  %v271_v60 = vpop.permute.xlu1 %270  ;;  %v273_v61 = vpop.permute.xlu0 %272 }
 0x122   :  { %v325_v62 = vmax.f32 %v718_v50, %v271_v60  ;;  %v326_v48 = vmax.f32 %v720_v51, %v273_v61 }
 0x123   :  { %445 = vst.msk [vmem:[%s859_s1 + $0x38] sm:$0x1] %vm438_vm8, %v428_v59  ;;  %v374_v63 = vld [vmem:[#allocation3 + $0x60] ss:$2 sm:$0xff]  ;;  %v406_v49 = vld [vmem:[#allocation3 + $0x61] ss:$2 sm:$0xff] }
 0x124   :  { %v429_v0 = vmax.f32 %v374_v63, %v406_v49  ;;  %v376_v1 = vld [vmem:[#allocation3 + $0x70] ss:$2 sm:$0x1]  ;;  %v408_v2 = vld [vmem:[#allocation3 + $0x71] ss:$2 sm:$0x1] }
 0x125   :  { %351 = vst.msk [vmem:[#allocation3 + $0x88] sm:$0x3] %vm335_vm7, %v325_v62  ;;  %v430_v3 = vmax.f32 %v376_v1, %v408_v2  ;;  %v275_v4 = vpop.permute.xlu1 %274  ;;  %v277_v5 = vpop.permute.xlu0 %276 }
 0x126   :  { %352 = vst.msk [vmem:[#allocation3 + $0x90] sm:$0xff] %vm332_vm6, %v326_v48  ;;  %446 = vst.msk [vmem:[%s859_s1 + $0x40] sm:$0xff] %vm332_vm6, %v429_v0  ;;  %v327_v50 = vmax.f32 %v726_v52, %v275_v4  ;;  %v328_v51 = vmax.f32 %v728_v53, %v277_v5 }
 0x127   :  { %447 = vst.msk [vmem:[%s859_s1 + $0x48] sm:$0x1] %vm438_vm8, %v430_v3 }
 0x128   :  { %v378_v6 = vld [vmem:[#allocation3 + $0x78] ss:$2 sm:$0xff]  ;;  %v410_v7 = vld [vmem:[#allocation3 + $0x79] ss:$2 sm:$0xff]  ;;  %353 = vst.msk [vmem:[#allocation3 + $0x98] sm:$0xff] %vm332_vm6, %v327_v50 }
 0x129   :  { %v431_v8 = vmax.f32 %v378_v6, %v410_v7  ;;  %354 = vst.msk [vmem:[#allocation3 + $0xa0] sm:$0x3] %vm335_vm7, %v328_v51  ;;  %v279_v9 = vpop.permute.xlu1 %278  ;;  %v281_v10 = vpop.permute.xlu0 %280 }
 0x12a   :  { %v329_v52 = vmax.f32 %v734_v54, %v279_v9  ;;  %v330_v53 = vmax.f32 %v736_v55, %v281_v10 }
 0x12b   :  { %448 = vst.msk [vmem:[%s859_s1 + $0x50] sm:$0xff] %vm332_vm6, %v431_v8 }
 0x12c   :  { %v380_v11 = vld [vmem:[#allocation3 + $0x88] ss:$2 sm:$0x1]  ;;  %v412_v12 = vld [vmem:[#allocation3 + $0x89] ss:$2 sm:$0x1] }
 0x12d   :  { %v432_v13 = vmax.f32 %v380_v11, %v412_v12  ;;  %355 = vst.msk [vmem:[#allocation3 + $0xa8] sm:$0xff] %vm332_vm6, %v329_v52  ;;  %356 = vst.msk [vmem:[#allocation3 + $0xb0] sm:$0xff] %vm332_vm6, %v330_v53  ;;  %v283_v14 = vpop.permute.xlu1 %282 }
 0x12e   :  { %v331_v15 = vmax.f32 %v742_v56, %v283_v14 }
 0x12f   :  { %449 = vst.msk [vmem:[%s859_s1 + $0x58] sm:$0x1] %vm438_vm8, %v432_v13  ;;  %v382_v16 = vld [vmem:[#allocation3 + $0x90] ss:$2 sm:$0xff]  ;;  %v414_v17 = vld [vmem:[#allocation3 + $0x91] ss:$2 sm:$0xff] }
 0x130   :  { %v433_v54 = vmax.f32 %v382_v16, %v414_v17  ;;  %v384_v18 = vld [vmem:[#allocation3 + $0xa0] ss:$2 sm:$0x1]  ;;  %v416_v55 = vld [vmem:[#allocation3 + $0xa1] ss:$2 sm:$0x1] }
 0x131   :  { %357 = vst.msk [vmem:[#allocation3 + $0xb8] sm:$0x3] %vm335_vm7, %v331_v15  ;;  %v434_v19 = vmax.f32 %v384_v18, %v416_v55 }
 0x132   :  { %450 = vst.msk [vmem:[%s859_s1 + $0x60] sm:$0xff] %vm332_vm6, %v433_v54 }
 0x133   :  { %451 = vst.msk [vmem:[%s859_s1 + $0x68] sm:$0x1] %vm438_vm8, %v434_v19 }
 0x134   :  { %v386_v20 = vld [vmem:[#allocation3 + $0xa8] ss:$2 sm:$0xff]  ;;  %v418_v56 = vld [vmem:[#allocation3 + $0xa9] ss:$2 sm:$0xff] }
 0x135   :  { %v435_v21 = vmax.f32 %v386_v20, %v418_v56 }
 0x137   :  { %452 = vst.msk [vmem:[%s859_s1 + $0x70] sm:$0xff] %vm332_vm6, %v435_v21 }
 0x138   :  { %v388_v22 = vld [vmem:[#allocation3 + $0xb8] ss:$2 sm:$0x1]  ;;  %v420_v23 = vld [vmem:[#allocation3 + $0xb9] ss:$2 sm:$0x1] }
 0x139   :  { %v436_v24 = vmax.f32 %v388_v22, %v420_v23 }
 0x13b   :  { %453 = vst.msk [vmem:[%s859_s1 + $0x78] sm:$0x1] %vm438_vm8, %v436_v24 }
 0x13c   :  { %458 = vsyncpa [#allocation5], 1 }

</bundles_post_ra>
